<compile_context>
chip_gen: v6e
topology: v6e:2x2x1
jax: 0.10.0
libtpu: 0.0.40
codegen_flags: <defaults>
</compile_context>

<pallas_src>
import functools
import math

import jax
import jax.numpy as jnp
from jax import lax
from jax.experimental import pallas as pl
from jax.experimental.pallas import tpu as pltpu


APPROX_SOFTMAX_RECIP = True  # exact-division fallback flag for strict parity tests


def _sublane_base(dtype):
    """Sublane packing granularity for a dtype (8 f32, 16 bf16, 32 int8/fp8)."""
    return max(8, 32 // jnp.dtype(dtype).itemsize)


def _tile(dim, target, base):
    """Largest multiple of `base` that divides `dim` and is <= target; else the full dim."""
    if dim <= target:
        return dim
    t = (target // base) * base
    while t >= base:
        if dim % t == 0:
            return t
        t -= base
    return dim


@functools.lru_cache(maxsize=None)
def _vmem_limit_bytes():
    """Explicit scoped-VMEM limit derived from the chip (96 MiB v5e/v6e, 48 MiB v7x)."""
    try:
        cap = int(pltpu.get_tpu_info().vmem_capacity_bytes)
        return int(min(cap * 3 // 4, 100 * 1024 * 1024))
    except Exception:
        return 48 * 1024 * 1024  # conservative fallback, safe on every generation


# ----------------------- kernel 1: QKV projection (full-K, no reduction axis) -----------------------

def _qkv_kernel(x_ref, wq_ref, wk_ref, wv_ref, bq_ref, bk_ref, bv_ref,
                q_ref, k_ref, v_ref):
    x = x_ref[...]                                           # (tm, E), native dtype
    for w_ref, b_ref, o_ref in ((wq_ref, bq_ref, q_ref),
                                (wk_ref, bk_ref, k_ref),
                                (wv_ref, bv_ref, v_ref)):
        y = (jnp.dot(x, w_ref[...], preferred_element_type=jnp.float32)
             + b_ref[...].astype(jnp.float32))
        o_ref[...] = y.astype(o_ref.dtype)


def qkv_projection(x, wq, wk, wv, bq, bk, bv, *, tm=256, tn=512):
    # x: (M, E); wq/wk/wv: (E, E) (already transposed from PyTorch layout, scale folded into wq)
    M, K = x.shape
    N = wq.shape[1]
    tm = _tile(M, tm, _sublane_base(x.dtype))
    tn = _tile(N, tn, 128)
    grid = (M // tm, N // tn)
    out_sds = jax.ShapeDtypeStruct((M, N), x.dtype)
    w_spec = pl.BlockSpec((K, tn), lambda i, j: (0, j))
    b_spec = pl.BlockSpec((1, tn), lambda i, j: (0, j))
    o_spec = pl.BlockSpec((tm, tn), lambda i, j: (i, j))
    return pl.pallas_call(
        _qkv_kernel,
        out_shape=(out_sds, out_sds, out_sds),
        grid=grid,
        in_specs=[
            pl.BlockSpec((tm, K), lambda i, j: (i, 0)),      # x row tile, resident across j
            w_spec, w_spec, w_spec,
            b_spec, b_spec, b_spec,
        ],
        out_specs=[o_spec, o_spec, o_spec],
        compiler_params=pltpu.CompilerParams(
            dimension_semantics=("parallel", "parallel"),
            vmem_limit_bytes=_vmem_limit_bytes()),
    )(x, wq, wk, wv, bq.reshape(1, N), bk.reshape(1, N), bv.reshape(1, N))


# ------ kernel 2: q-tiled attention (per-head out_proj accumulation) + residual + LayerNorm1 ------

def _attn_block_kernel(q_ref, k_ref, v_ref, x_ref, wo_ref, bo_ref, g_ref, beta_ref,
                       o_ref, *, nhead, eps, approx_recip):
    tq = q_ref.shape[1]
    E = q_ref.shape[2]
    D = E // nhead

    q = q_ref[0]                                             # (tq, E); 1/sqrt(D) already folded in
    k = k_ref[0]                                             # (S, E)
    v = v_ref[0]                                             # (S, E)

    # Per-head: scores -> softmax -> PV -> out_proj, accumulated into a lane-dense (tq, E) f32
    # accumulator.  No concat of head outputs; each head's (tq,S)/(tq,D) temporaries die here.
    proj = jnp.zeros((tq, E), jnp.float32)
    for h in range(nhead):                                   # static loop; heads stay lane-packed
        sl = slice(h * D, (h + 1) * D)
        qh, kh, vh = q[:, sl], k[:, sl], v[:, sl]
        # contract on last dims directly -- no explicit .T / XLU transpose before the MXU
        s = lax.dot_general(qh, kh, (((1,), (1,)), ((), ())),
                            preferred_element_type=jnp.float32)          # (tq, S) f32
        s = s - jnp.max(s, axis=-1, keepdims=True)
        p = jnp.exp(s)
        denom = jnp.sum(p, axis=-1, keepdims=True)
        if approx_recip:
            p = p * pl.reciprocal(denom, approx=True)        # EUP slot, nearly free
        else:
            p = p / denom
        head = jnp.dot(p.astype(vh.dtype), vh,
                       preferred_element_type=jnp.float32)               # (tq, D) f32
        proj = proj + jnp.dot(head.astype(wo_ref.dtype),
                              wo_ref[pl.ds(h * D, D), :],
                              preferred_element_type=jnp.float32)        # (tq, E) f32

    # fused out_proj bias + residual add + LayerNorm1 (epilogue math in f32)
    z = x_ref[0].astype(jnp.float32) + proj + bo_ref[...].astype(jnp.float32)
    mu = jnp.mean(z, axis=-1, keepdims=True)
    var = jnp.mean(jnp.square(z - mu), axis=-1, keepdims=True)
    zn = (z - mu) * lax.rsqrt(var + eps)
    o_ref[0] = (zn * g_ref[...].astype(jnp.float32)
                + beta_ref[...].astype(jnp.float32)).astype(o_ref.dtype)


def attention_block(q, k, v, x, wo_t, bo, ln_g, ln_b, nhead, *, eps=1e-5, tq=256):
    # q/k/v/x: (B, S, E) batch-major.  Grid (B, S//tq): q-tiling bounds VMEM to O(tq*S) and gives
    # the megacore scheduler a second parallel axis; K/V index maps are constant in qi so they
    # stay resident per batch element.
    B, S, E = q.shape
    tq = _tile(S, tq, _sublane_base(x.dtype))
    grid = (B, S // tq)
    qx_spec = pl.BlockSpec((1, tq, E), lambda b, qi: (b, qi, 0))
    kv_spec = pl.BlockSpec((1, S, E), lambda b, qi: (b, 0, 0))
    vec_spec = pl.BlockSpec((1, E), lambda b, qi: (0, 0))
    return pl.pallas_call(
        functools.partial(_attn_block_kernel, nhead=nhead, eps=eps,
                          approx_recip=APPROX_SOFTMAX_RECIP),
        out_shape=jax.ShapeDtypeStruct((B, S, E), x.dtype),
        grid=grid,
        in_specs=[
            qx_spec,                                         # q tile
            kv_spec,                                         # k, full sequence, resident per b
            kv_spec,                                         # v, full sequence, resident per b
            qx_spec,                                         # residual x tile
            pl.BlockSpec((E, E), lambda b, qi: (0, 0)),      # out_proj weight, resident
            vec_spec, vec_spec, vec_spec,                    # out_proj bias, LN gamma/beta
        ],
        out_specs=qx_spec,
        compiler_params=pltpu.CompilerParams(
            dimension_semantics=("parallel", "parallel"),
            vmem_limit_bytes=_vmem_limit_bytes()),
    )(q, k, v, x, wo_t, bo.reshape(1, E), ln_g.reshape(1, E), ln_b.reshape(1, E))


# ------------ kernel 3: FF-tiled FFN (lin1 + ReLU + lin2) + residual + LayerNorm2 ------------

def _ffn_kernel(x_ref, w1_ref, b1_ref, w2_ref, b2_ref, g_ref, beta_ref, o_ref, acc_ref, *, eps):
    j = pl.program_id(1)

    @pl.when(j == 0)
    def _():
        acc_ref[...] = jnp.zeros_like(acc_ref)

    x = x_ref[...]                                           # (tm, E), resident across j
    h = (jnp.dot(x, w1_ref[...], preferred_element_type=jnp.float32)
         + b1_ref[...].astype(jnp.float32))
    h = jnp.maximum(h, 0.0)                                  # (tm, tf) f32, never leaves VMEM
    acc_ref[...] += jnp.dot(h.astype(w2_ref.dtype), w2_ref[...],
                            preferred_element_type=jnp.float32)

    @pl.when(j == pl.num_programs(1) - 1)
    def _():
        z = x.astype(jnp.float32) + acc_ref[...] + b2_ref[...].astype(jnp.float32)
        mu = jnp.mean(z, axis=-1, keepdims=True)
        var = jnp.mean(jnp.square(z - mu), axis=-1, keepdims=True)
        zn = (z - mu) * lax.rsqrt(var + eps)
        o_ref[...] = (zn * g_ref[...].astype(jnp.float32)
                      + beta_ref[...].astype(jnp.float32)).astype(o_ref.dtype)


def ffn_block(x, w1_t, b1, w2_t, b2, ln_g, ln_b, *, eps=1e-5, tm=256, tf=1024):
    # FF reduction grid axis bounds the resident weight footprint to E*tf + tf*E per step,
    # independent of dim_feedforward.
    M, E = x.shape
    FF = w1_t.shape[1]
    tm = _tile(M, tm, _sublane_base(x.dtype))
    tf = _tile(FF, tf, 128)
    grid = (M // tm, FF // tf)
    vec_spec = pl.BlockSpec((1, E), lambda i, j: (0, 0))
    return pl.pallas_call(
        functools.partial(_ffn_kernel, eps=eps),
        out_shape=jax.ShapeDtypeStruct((M, E), x.dtype),
        grid=grid,
        in_specs=[
            pl.BlockSpec((tm, E), lambda i, j: (i, 0)),      # x tile, resident across j
            pl.BlockSpec((E, tf), lambda i, j: (0, j)),      # w1 FF-column tile
            pl.BlockSpec((1, tf), lambda i, j: (0, j)),      # b1 FF tile
            pl.BlockSpec((tf, E), lambda i, j: (j, 0)),      # w2 FF-row tile
            vec_spec, vec_spec, vec_spec,                    # b2, LN gamma, LN beta
        ],
        out_specs=pl.BlockSpec((tm, E), lambda i, j: (i, 0)),
        scratch_shapes=[pltpu.VMEM((tm, E), jnp.float32)],
        compiler_params=pltpu.CompilerParams(
            dimension_semantics=("parallel", "arbitrary"),
            vmem_limit_bytes=_vmem_limit_bytes()),
    )(x, w1_t, b1.reshape(1, FF), w2_t, b2.reshape(1, E), ln_g.reshape(1, E), ln_b.reshape(1, E))


# ----------------------------------- layer wrapper -----------------------------------

def init_params(key, emb_dim, nhead, dim_feedforward):
    ks = jax.random.split(key, 4)
    s = 0.02
    return {
        "in_proj_w": jax.random.normal(ks[0], (3 * emb_dim, emb_dim), jnp.float32) * s,
        "in_proj_b": jnp.zeros((3 * emb_dim,), jnp.float32),
        "out_proj_w": jax.random.normal(ks[1], (emb_dim, emb_dim), jnp.float32) * s,
        "out_proj_b": jnp.zeros((emb_dim,), jnp.float32),
        "lin1_w": jax.random.normal(ks[2], (dim_feedforward, emb_dim), jnp.float32) * s,
        "lin1_b": jnp.zeros((dim_feedforward,), jnp.float32),
        "lin2_w": jax.random.normal(ks[3], (emb_dim, dim_feedforward), jnp.float32) * s,
        "lin2_b": jnp.zeros((emb_dim,), jnp.float32),
        "ln1_g": jnp.ones((emb_dim,), jnp.float32),
        "ln1_b": jnp.zeros((emb_dim,), jnp.float32),
        "ln2_g": jnp.ones((emb_dim,), jnp.float32),
        "ln2_b": jnp.zeros((emb_dim,), jnp.float32),
    }


def pyraformer_layer(src, params, nhead):
    # src: (S, B, E) -- PyTorch nn.MultiheadAttention default layout (batch_first=False).
    S, B, E = src.shape
    D = E // nhead
    scale = 1.0 / math.sqrt(D)

    # Batch-major internally so heads stay packed along lanes; one (S,B,E)<->(B,S,E) transpose
    # at each boundary.  TODO(synk): fuse these transposes into kernels 1 and 3.
    x3 = jnp.transpose(src, (1, 0, 2))                       # (B, S, E)
    x2d = x3.reshape(B * S, E)

    # fold 1/sqrt(D) into the q projection (zero cost inside the attention kernel)
    w_in, b_in = params["in_proj_w"], params["in_proj_b"]    # PyTorch layout (3E, E), (3E,)
    wq = (w_in[:E] * scale).T
    wk = w_in[E:2 * E].T
    wv = w_in[2 * E:].T
    bq = b_in[:E] * scale
    bk = b_in[E:2 * E]
    bv = b_in[2 * E:]

    # ---- QKV projection (full-K tiled linear, three lane-dense outputs) ----
    q2d, k2d, v2d = qkv_projection(x2d, wq, wk, wv, bq, bk, bv)          # each (B*S, E)
    q3 = q2d.reshape(B, S, E)
    k3 = k2d.reshape(B, S, E)
    v3 = v2d.reshape(B, S, E)

    # ---- q-tiled attention + out_proj + residual + LayerNorm1, fused ----
    x3 = attention_block(q3, k3, v3, x3, params["out_proj_w"].T, params["out_proj_b"],
                         params["ln1_g"], params["ln1_b"], nhead)        # (B, S, E)

    # ---- FF-tiled FFN + residual + LayerNorm2, fused ----
    out2d = ffn_block(x3.reshape(B * S, E),
                      params["lin1_w"].T, params["lin1_b"],
                      params["lin2_w"].T, params["lin2_b"],
                      params["ln2_g"], params["ln2_b"])                  # (B*S, E)

    return jnp.transpose(out2d.reshape(B, S, E), (1, 0, 2))              # (S, B, E)


# ----------------------------- reference (pure JAX) -----------------------------

def pyraformer_layer_ref(src, p, nhead):
    S, B, E = src.shape
    H, D = nhead, E // nhead
    x = src.reshape(S * B, E)
    qkv = x @ p["in_proj_w"].T + p["in_proj_b"]
    q, k, v = jnp.split(qkv, 3, axis=-1)

    def heads(t):
        return t.reshape(S, B, H, D).transpose(1, 2, 0, 3)   # (B,H,S,D)

    qh, kh, vh = heads(q), heads(k), heads(v)
    sc = jnp.einsum("bhqd,bhkd->bhqk", qh, kh) / math.sqrt(D)
    p_attn = jax.nn.softmax(sc, axis=-1)
    oh = jnp.einsum("bhqk,bhkd->bhqd", p_attn, vh)
    o = oh.transpose(2, 0, 1, 3).reshape(S * B, E)
    src2 = o @ p["out_proj_w"].T + p["out_proj_b"]

    def ln(z, g, b, eps=1e-5):
        mu = z.mean(-1, keepdims=True)
        var = ((z - mu) ** 2).mean(-1, keepdims=True)
        return (z - mu) / jnp.sqrt(var + eps) * g + b

    x = ln(x + src2, p["ln1_g"], p["ln1_b"])
    h = jnp.maximum(x @ p["lin1_w"].T + p["lin1_b"], 0.0)
    src2 = h @ p["lin2_w"].T + p["lin2_b"]
    x = ln(x + src2, p["ln2_g"], p["ln2_b"])
    return x.reshape(S, B, E)


# ----------------------------------- main -----------------------------------

if __name__ == "__main__":
    emb_dim, nhead, dim_feedforward = 32, 4, 64
    S, B = 8, 2

    key = jax.random.PRNGKey(0)
    k_src, k_par = jax.random.split(key)
    src = jax.random.normal(k_src, (S, B, emb_dim), jnp.float32)
    params = init_params(k_par, emb_dim, nhead, dim_feedforward)

    run = jax.jit(functools.partial(pyraformer_layer, nhead=nhead))
    out = jax.block_until_ready(run(src, params))

    ref = pyraformer_layer_ref(src, params, nhead)
    assert out.shape == (S, B, emb_dim)
    # tolerance slightly relaxed vs exact division: softmax denominator uses the EUP
    # approximate reciprocal (pl.reciprocal(..., approx=True)); set APPROX_SOFTMAX_RECIP=False
    # for exact division.
    assert jnp.allclose(out, ref, atol=2e-3, rtol=2e-3), "mismatch vs reference"

    print("KERNEL_OK")
</pallas_src>

<mosaic_0001>
module attributes {stable_mosaic.version = 11 : i64} {
  func.func @_qkv_kernel(%arg0: i32, %arg1: i32, %arg2: memref<16x32xf32, #tpu.memory_space<vmem>>, %arg3: memref<32x32xf32, #tpu.memory_space<vmem>>, %arg4: memref<32x32xf32, #tpu.memory_space<vmem>>, %arg5: memref<32x32xf32, #tpu.memory_space<vmem>>, %arg6: memref<1x32xf32, #tpu.memory_space<vmem>>, %arg7: memref<1x32xf32, #tpu.memory_space<vmem>>, %arg8: memref<1x32xf32, #tpu.memory_space<vmem>>, %arg9: memref<16x32xf32, #tpu.memory_space<vmem>>, %arg10: memref<16x32xf32, #tpu.memory_space<vmem>>, %arg11: memref<16x32xf32, #tpu.memory_space<vmem>>) attributes {dimension_semantics = [#tpu.dimension_semantics<parallel>, #tpu.dimension_semantics<parallel>], iteration_bounds = array<i64: 1, 1>, scalar_prefetch = 0 : i64, scratch_operands = 0 : i64, tpu.core_type = #tpu.core_type<tc>, window_params = [{transform_indices = @transform_0, window_bounds = array<i64: 16, 32>}, {transform_indices = @transform_1, window_bounds = array<i64: 32, 32>}, {transform_indices = @transform_2, window_bounds = array<i64: 32, 32>}, {transform_indices = @transform_3, window_bounds = array<i64: 32, 32>}, {transform_indices = @transform_4, window_bounds = array<i64: 1, 32>}, {transform_indices = @transform_5, window_bounds = array<i64: 1, 32>}, {transform_indices = @transform_6, window_bounds = array<i64: 1, 32>}, {transform_indices = @transform_7, window_bounds = array<i64: 16, 32>}, {transform_indices = @transform_8, window_bounds = array<i64: 16, 32>}, {transform_indices = @transform_9, window_bounds = array<i64: 16, 32>}]} {
    %c0 = arith.constant 0 : index
    %c0_0 = arith.constant 0 : index
    %0 = vector.load %arg2[%c0, %c0_0] : memref<16x32xf32, #tpu.memory_space<vmem>>, vector<16x32xf32>
    %c0_1 = arith.constant 0 : index
    %c0_2 = arith.constant 0 : index
    %1 = vector.load %arg3[%c0_1, %c0_2] : memref<32x32xf32, #tpu.memory_space<vmem>>, vector<32x32xf32>
    %cst = arith.constant dense<0.000000e+00> : vector<16x32xf32>
    %2 = tpu.matmul %0, %1, %cst {dimension_numbers = #tpu.dot_dimension_numbers<[1], [0], [0], [1], [0, 0, 1, 1], [], []>} : vector<16x32xf32>, vector<32x32xf32>, vector<16x32xf32> -> vector<16x32xf32>
    %c0_3 = arith.constant 0 : index
    %c0_4 = arith.constant 0 : index
    %3 = vector.load %arg6[%c0_3, %c0_4] : memref<1x32xf32, #tpu.memory_space<vmem>>, vector<1x32xf32>
    %4 = vector.broadcast %3 : vector<1x32xf32> to vector<16x32xf32>
    %5 = arith.addf %2, %4 : vector<16x32xf32>
    %c0_5 = arith.constant 0 : index
    %c0_6 = arith.constant 0 : index
    %6 = vector.load %arg9[%c0_5, %c0_6] : memref<16x32xf32, #tpu.memory_space<vmem>>, vector<16x32xf32>
    tpu.vector_store %arg9[%c0_5, %c0_6], %5 {strides = array<i32>} : memref<16x32xf32, #tpu.memory_space<vmem>>, vector<16x32xf32>,
    %c0_7 = arith.constant 0 : index
    %c0_8 = arith.constant 0 : index
    %7 = vector.load %arg4[%c0_7, %c0_8] : memref<32x32xf32, #tpu.memory_space<vmem>>, vector<32x32xf32>
    %cst_9 = arith.constant dense<0.000000e+00> : vector<16x32xf32>
    %8 = tpu.matmul %0, %7, %cst_9 {dimension_numbers = #tpu.dot_dimension_numbers<[1], [0], [0], [1], [0, 0, 1, 1], [], []>} : vector<16x32xf32>, vector<32x32xf32>, vector<16x32xf32> -> vector<16x32xf32>
    %c0_10 = arith.constant 0 : index
    %c0_11 = arith.constant 0 : index
    %9 = vector.load %arg7[%c0_10, %c0_11] : memref<1x32xf32, #tpu.memory_space<vmem>>, vector<1x32xf32>
    %10 = vector.broadcast %9 : vector<1x32xf32> to vector<16x32xf32>
    %11 = arith.addf %8, %10 : vector<16x32xf32>
    %c0_12 = arith.constant 0 : index
    %c0_13 = arith.constant 0 : index
    %12 = vector.load %arg10[%c0_12, %c0_13] : memref<16x32xf32, #tpu.memory_space<vmem>>, vector<16x32xf32>
    tpu.vector_store %arg10[%c0_12, %c0_13], %11 {strides = array<i32>} : memref<16x32xf32, #tpu.memory_space<vmem>>, vector<16x32xf32>,
    %c0_14 = arith.constant 0 : index
    %c0_15 = arith.constant 0 : index
    %13 = vector.load %arg5[%c0_14, %c0_15] : memref<32x32xf32, #tpu.memory_space<vmem>>, vector<32x32xf32>
    %cst_16 = arith.constant dense<0.000000e+00> : vector<16x32xf32>
    %14 = tpu.matmul %0, %13, %cst_16 {dimension_numbers = #tpu.dot_dimension_numbers<[1], [0], [0], [1], [0, 0, 1, 1], [], []>} : vector<16x32xf32>, vector<32x32xf32>, vector<16x32xf32> -> vector<16x32xf32>
    %c0_17 = arith.constant 0 : index
    %c0_18 = arith.constant 0 : index
    %15 = vector.load %arg8[%c0_17, %c0_18] : memref<1x32xf32, #tpu.memory_space<vmem>>, vector<1x32xf32>
    %16 = vector.broadcast %15 : vector<1x32xf32> to vector<16x32xf32>
    %17 = arith.addf %14, %16 : vector<16x32xf32>
    %c0_19 = arith.constant 0 : index
    %c0_20 = arith.constant 0 : index
    %18 = vector.load %arg11[%c0_19, %c0_20] : memref<16x32xf32, #tpu.memory_space<vmem>>, vector<16x32xf32>
    tpu.vector_store %arg11[%c0_19, %c0_20], %17 {strides = array<i32>} : memref<16x32xf32, #tpu.memory_space<vmem>>, vector<16x32xf32>,
    return
  }
  func.func @transform_0(%arg0: i32, %arg1: i32) -> (i32, i32) {
    %c0_i32 = arith.constant 0 : i32
    %c0_i32_0 = arith.constant 0 : i32
    return %arg0, %c0_i32 : i32, i32
  }
  func.func @transform_1(%arg0: i32, %arg1: i32) -> (i32, i32) {
    %c0_i32 = arith.constant 0 : i32
    %c0_i32_0 = arith.constant 0 : i32
    return %c0_i32, %arg1 : i32, i32
  }
  func.func @transform_2(%arg0: i32, %arg1: i32) -> (i32, i32) {
    %c0_i32 = arith.constant 0 : i32
    %c0_i32_0 = arith.constant 0 : i32
    return %c0_i32, %arg1 : i32, i32
  }
  func.func @transform_3(%arg0: i32, %arg1: i32) -> (i32, i32) {
    %c0_i32 = arith.constant 0 : i32
    %c0_i32_0 = arith.constant 0 : i32
    return %c0_i32, %arg1 : i32, i32
  }
  func.func @transform_4(%arg0: i32, %arg1: i32) -> (i32, i32) {
    %c0_i32 = arith.constant 0 : i32
    %c0_i32_0 = arith.constant 0 : i32
    return %c0_i32, %arg1 : i32, i32
  }
  func.func @transform_5(%arg0: i32, %arg1: i32) -> (i32, i32) {
    %c0_i32 = arith.constant 0 : i32
    %c0_i32_0 = arith.constant 0 : i32
    return %c0_i32, %arg1 : i32, i32
  }
  func.func @transform_6(%arg0: i32, %arg1: i32) -> (i32, i32) {
    %c0_i32 = arith.constant 0 : i32
    %c0_i32_0 = arith.constant 0 : i32
    return %c0_i32, %arg1 : i32, i32
  }
  func.func @transform_7(%arg0: i32, %arg1: i32) -> (i32, i32) {
    %c0_i32 = arith.constant 0 : i32
    return %arg0, %arg1 : i32, i32
  }
  func.func @transform_8(%arg0: i32, %arg1: i32) -> (i32, i32) {
    %c0_i32 = arith.constant 0 : i32
    return %arg0, %arg1 : i32, i32
  }
  func.func @transform_9(%arg0: i32, %arg1: i32) -> (i32, i32) {
    %c0_i32 = arith.constant 0 : i32
    return %arg0, %arg1 : i32, i32
  }
}

module attributes {stable_mosaic.version = 11 : i64} {
  func.func @_attn_block_kernel(%arg0: i32, %arg1: i32, %arg2: memref<1x8x32xf32, #tpu.memory_space<vmem>>, %arg3: memref<1x8x32xf32, #tpu.memory_space<vmem>>, %arg4: memref<1x8x32xf32, #tpu.memory_space<vmem>>, %arg5: memref<1x8x32xf32, #tpu.memory_space<vmem>>, %arg6: memref<32x32xf32, #tpu.memory_space<vmem>>, %arg7: memref<1x32xf32, #tpu.memory_space<vmem>>, %arg8: memref<1x32xf32, #tpu.memory_space<vmem>>, %arg9: memref<1x32xf32, #tpu.memory_space<vmem>>, %arg10: memref<1x8x32xf32, #tpu.memory_space<vmem>>) attributes {dimension_semantics = [#tpu.dimension_semantics<parallel>, #tpu.dimension_semantics<parallel>], iteration_bounds = array<i64: 2, 1>, scalar_prefetch = 0 : i64, scratch_operands = 0 : i64, tpu.core_type = #tpu.core_type<tc>, window_params = [{transform_indices = @transform_0, window_bounds = array<i64: 1, 8, 32>}, {transform_indices = @transform_1, window_bounds = array<i64: 1, 8, 32>}, {transform_indices = @transform_2, window_bounds = array<i64: 1, 8, 32>}, {transform_indices = @transform_3, window_bounds = array<i64: 1, 8, 32>}, {pipeline_mode = #tpu.pipeline_mode<synchronous>, transform_indices = @transform_4, window_bounds = array<i64: 32, 32>}, {pipeline_mode = #tpu.pipeline_mode<synchronous>, transform_indices = @transform_5, window_bounds = array<i64: 1, 32>}, {pipeline_mode = #tpu.pipeline_mode<synchronous>, transform_indices = @transform_6, window_bounds = array<i64: 1, 32>}, {pipeline_mode = #tpu.pipeline_mode<synchronous>, transform_indices = @transform_7, window_bounds = array<i64: 1, 32>}, {transform_indices = @transform_8, window_bounds = array<i64: 1, 8, 32>}]} {
    %c0 = arith.constant 0 : index
    %c0_0 = arith.constant 0 : index
    %c0_1 = arith.constant 0 : index
    %0 = vector.load %arg2[%c0, %c0_0, %c0_1] : memref<1x8x32xf32, #tpu.memory_space<vmem>>, vector<1x8x32xf32>
    %1 = vector.shape_cast %0 : vector<1x8x32xf32> to vector<8x32xf32>
    %c0_2 = arith.constant 0 : index
    %c0_3 = arith.constant 0 : index
    %c0_4 = arith.constant 0 : index
    %2 = vector.load %arg3[%c0_2, %c0_3, %c0_4] : memref<1x8x32xf32, #tpu.memory_space<vmem>>, vector<1x8x32xf32>
    %3 = vector.shape_cast %2 : vector<1x8x32xf32> to vector<8x32xf32>
    %c0_5 = arith.constant 0 : index
    %c0_6 = arith.constant 0 : index
    %c0_7 = arith.constant 0 : index
    %4 = vector.load %arg4[%c0_5, %c0_6, %c0_7] : memref<1x8x32xf32, #tpu.memory_space<vmem>>, vector<1x8x32xf32>
    %5 = vector.shape_cast %4 : vector<1x8x32xf32> to vector<8x32xf32>
    %cst = arith.constant 0.000000e+00 : f32
    %6 = vector.broadcast %cst : f32 to vector<8x32xf32>
    %7 = vector.extract_strided_slice %1 {offsets = [0, 0], sizes = [8, 8], strides = [1, 1]} : vector<8x32xf32> to vector<8x8xf32>
    %8 = vector.extract_strided_slice %3 {offsets = [0, 0], sizes = [8, 8], strides = [1, 1]} : vector<8x32xf32> to vector<8x8xf32>
    %9 = vector.extract_strided_slice %5 {offsets = [0, 0], sizes = [8, 8], strides = [1, 1]} : vector<8x32xf32> to vector<8x8xf32>
    %cst_8 = arith.constant dense<0.000000e+00> : vector<8x8xf32>
    %10 = tpu.matmul %7, %8, %cst_8 {dimension_numbers = #tpu.dot_dimension_numbers<[1], [1], [0], [0], [0, 0, 1, 0], [], []>} : vector<8x8xf32>, vector<8x8xf32>, vector<8x8xf32> -> vector<8x8xf32>
    %cst_9 = arith.constant dense<0xFF800000> : vector<8xf32>
    %11 = vector.multi_reduction <maximumf>, %10, %cst_9 [1] : vector<8x8xf32> to vector<8xf32>
    %12 = vector.shape_cast %11 : vector<8xf32> to vector<8x1xf32>
    %13 = vector.broadcast %12 : vector<8x1xf32> to vector<8x8xf32>
    %14 = arith.subf %10, %13 : vector<8x8xf32>
    %15 = math.exp %14 : vector<8x8xf32>
    %cst_10 = arith.constant dense<0.000000e+00> : vector<8xf32>
    %16 = vector.multi_reduction <add>, %15, %cst_10 [1] : vector<8x8xf32> to vector<8xf32>
    %17 = vector.shape_cast %16 : vector<8xf32> to vector<8x1xf32>
    %18 = tpu.reciprocal %17 {approx = true} : vector<8x1xf32> -> vector<8x1xf32>
    %19 = vector.broadcast %18 : vector<8x1xf32> to vector<8x8xf32>
    %20 = arith.mulf %15, %19 : vector<8x8xf32>
    %cst_11 = arith.constant dense<0.000000e+00> : vector<8x8xf32>
    %21 = tpu.matmul %20, %9, %cst_11 {dimension_numbers = #tpu.dot_dimension_numbers<[1], [0], [0], [1], [0, 0, 1, 1], [], []>} : vector<8x8xf32>, vector<8x8xf32>, vector<8x8xf32> -> vector<8x8xf32>
    %c0_12 = arith.constant 0 : index
    %c0_13 = arith.constant 0 : index
    %22 = vector.load %arg6[%c0_12, %c0_13] : memref<32x32xf32, #tpu.memory_space<vmem>>, vector<8x32xf32>
    %cst_14 = arith.constant dense<0.000000e+00> : vector<8x32xf32>
    %23 = tpu.matmul %21, %22, %cst_14 {dimension_numbers = #tpu.dot_dimension_numbers<[1], [0], [0], [1], [0, 0, 1, 1], [], []>} : vector<8x8xf32>, vector<8x32xf32>, vector<8x32xf32> -> vector<8x32xf32>
    %24 = arith.addf %6, %23 : vector<8x32xf32>
    %25 = vector.extract_strided_slice %1 {offsets = [0, 8], sizes = [8, 8], strides = [1, 1]} : vector<8x32xf32> to vector<8x8xf32>
    %26 = vector.extract_strided_slice %3 {offsets = [0, 8], sizes = [8, 8], strides = [1, 1]} : vector<8x32xf32> to vector<8x8xf32>
    %27 = vector.extract_strided_slice %5 {offsets = [0, 8], sizes = [8, 8], strides = [1, 1]} : vector<8x32xf32> to vector<8x8xf32>
    %cst_15 = arith.constant dense<0.000000e+00> : vector<8x8xf32>
    %28 = tpu.matmul %25, %26, %cst_15 {dimension_numbers = #tpu.dot_dimension_numbers<[1], [1], [0], [0], [0, 0, 1, 0], [], []>} : vector<8x8xf32>, vector<8x8xf32>, vector<8x8xf32> -> vector<8x8xf32>
    %cst_16 = arith.constant dense<0xFF800000> : vector<8xf32>
    %29 = vector.multi_reduction <maximumf>, %28, %cst_16 [1] : vector<8x8xf32> to vector<8xf32>
    %30 = vector.shape_cast %29 : vector<8xf32> to vector<8x1xf32>
    %31 = vector.broadcast %30 : vector<8x1xf32> to vector<8x8xf32>
    %32 = arith.subf %28, %31 : vector<8x8xf32>
    %33 = math.exp %32 : vector<8x8xf32>
    %cst_17 = arith.constant dense<0.000000e+00> : vector<8xf32>
    %34 = vector.multi_reduction <add>, %33, %cst_17 [1] : vector<8x8xf32> to vector<8xf32>
    %35 = vector.shape_cast %34 : vector<8xf32> to vector<8x1xf32>
    %36 = tpu.reciprocal %35 {approx = true} : vector<8x1xf32> -> vector<8x1xf32>
    %37 = vector.broadcast %36 : vector<8x1xf32> to vector<8x8xf32>
    %38 = arith.mulf %33, %37 : vector<8x8xf32>
    %cst_18 = arith.constant dense<0.000000e+00> : vector<8x8xf32>
    %39 = tpu.matmul %38, %27, %cst_18 {dimension_numbers = #tpu.dot_dimension_numbers<[1], [0], [0], [1], [0, 0, 1, 1], [], []>} : vector<8x8xf32>, vector<8x8xf32>, vector<8x8xf32> -> vector<8x8xf32>
    %c8 = arith.constant 8 : index
    %c0_19 = arith.constant 0 : index
    %40 = vector.load %arg6[%c8, %c0_19] : memref<32x32xf32, #tpu.memory_space<vmem>>, vector<8x32xf32>
    %cst_20 = arith.constant dense<0.000000e+00> : vector<8x32xf32>
    %41 = tpu.matmul %39, %40, %cst_20 {dimension_numbers = #tpu.dot_dimension_numbers<[1], [0], [0], [1], [0, 0, 1, 1], [], []>} : vector<8x8xf32>, vector<8x32xf32>, vector<8x32xf32> -> vector<8x32xf32>
    %42 = arith.addf %24, %41 : vector<8x32xf32>
    %43 = vector.extract_strided_slice %1 {offsets = [0, 16], sizes = [8, 8], strides = [1, 1]} : vector<8x32xf32> to vector<8x8xf32>
    %44 = vector.extract_strided_slice %3 {offsets = [0, 16], sizes = [8, 8], strides = [1, 1]} : vector<8x32xf32> to vector<8x8xf32>
    %45 = vector.extract_strided_slice %5 {offsets = [0, 16], sizes = [8, 8], strides = [1, 1]} : vector<8x32xf32> to vector<8x8xf32>
    %cst_21 = arith.constant dense<0.000000e+00> : vector<8x8xf32>
    %46 = tpu.matmul %43, %44, %cst_21 {dimension_numbers = #tpu.dot_dimension_numbers<[1], [1], [0], [0], [0, 0, 1, 0], [], []>} : vector<8x8xf32>, vector<8x8xf32>, vector<8x8xf32> -> vector<8x8xf32>
    %cst_22 = arith.constant dense<0xFF800000> : vector<8xf32>
    %47 = vector.multi_reduction <maximumf>, %46, %cst_22 [1] : vector<8x8xf32> to vector<8xf32>
    %48 = vector.shape_cast %47 : vector<8xf32> to vector<8x1xf32>
    %49 = vector.broadcast %48 : vector<8x1xf32> to vector<8x8xf32>
    %50 = arith.subf %46, %49 : vector<8x8xf32>
    %51 = math.exp %50 : vector<8x8xf32>
    %cst_23 = arith.constant dense<0.000000e+00> : vector<8xf32>
    %52 = vector.multi_reduction <add>, %51, %cst_23 [1] : vector<8x8xf32> to vector<8xf32>
    %53 = vector.shape_cast %52 : vector<8xf32> to vector<8x1xf32>
    %54 = tpu.reciprocal %53 {approx = true} : vector<8x1xf32> -> vector<8x1xf32>
    %55 = vector.broadcast %54 : vector<8x1xf32> to vector<8x8xf32>
    %56 = arith.mulf %51, %55 : vector<8x8xf32>
    %cst_24 = arith.constant dense<0.000000e+00> : vector<8x8xf32>
    %57 = tpu.matmul %56, %45, %cst_24 {dimension_numbers = #tpu.dot_dimension_numbers<[1], [0], [0], [1], [0, 0, 1, 1], [], []>} : vector<8x8xf32>, vector<8x8xf32>, vector<8x8xf32> -> vector<8x8xf32>
    %c16 = arith.constant 16 : index
    %c0_25 = arith.constant 0 : index
    %58 = vector.load %arg6[%c16, %c0_25] : memref<32x32xf32, #tpu.memory_space<vmem>>, vector<8x32xf32>
    %cst_26 = arith.constant dense<0.000000e+00> : vector<8x32xf32>
    %59 = tpu.matmul %57, %58, %cst_26 {dimension_numbers = #tpu.dot_dimension_numbers<[1], [0], [0], [1], [0, 0, 1, 1], [], []>} : vector<8x8xf32>, vector<8x32xf32>, vector<8x32xf32> -> vector<8x32xf32>
    %60 = arith.addf %42, %59 : vector<8x32xf32>
    %61 = vector.extract_strided_slice %1 {offsets = [0, 24], sizes = [8, 8], strides = [1, 1]} : vector<8x32xf32> to vector<8x8xf32>
    %62 = vector.extract_strided_slice %3 {offsets = [0, 24], sizes = [8, 8], strides = [1, 1]} : vector<8x32xf32> to vector<8x8xf32>
    %63 = vector.extract_strided_slice %5 {offsets = [0, 24], sizes = [8, 8], strides = [1, 1]} : vector<8x32xf32> to vector<8x8xf32>
    %cst_27 = arith.constant dense<0.000000e+00> : vector<8x8xf32>
    %64 = tpu.matmul %61, %62, %cst_27 {dimension_numbers = #tpu.dot_dimension_numbers<[1], [1], [0], [0], [0, 0, 1, 0], [], []>} : vector<8x8xf32>, vector<8x8xf32>, vector<8x8xf32> -> vector<8x8xf32>
    %cst_28 = arith.constant dense<0xFF800000> : vector<8xf32>
    %65 = vector.multi_reduction <maximumf>, %64, %cst_28 [1] : vector<8x8xf32> to vector<8xf32>
    %66 = vector.shape_cast %65 : vector<8xf32> to vector<8x1xf32>
    %67 = vector.broadcast %66 : vector<8x1xf32> to vector<8x8xf32>
    %68 = arith.subf %64, %67 : vector<8x8xf32>
    %69 = math.exp %68 : vector<8x8xf32>
    %cst_29 = arith.constant dense<0.000000e+00> : vector<8xf32>
    %70 = vector.multi_reduction <add>, %69, %cst_29 [1] : vector<8x8xf32> to vector<8xf32>
    %71 = vector.shape_cast %70 : vector<8xf32> to vector<8x1xf32>
    %72 = tpu.reciprocal %71 {approx = true} : vector<8x1xf32> -> vector<8x1xf32>
    %73 = vector.broadcast %72 : vector<8x1xf32> to vector<8x8xf32>
    %74 = arith.mulf %69, %73 : vector<8x8xf32>
    %cst_30 = arith.constant dense<0.000000e+00> : vector<8x8xf32>
    %75 = tpu.matmul %74, %63, %cst_30 {dimension_numbers = #tpu.dot_dimension_numbers<[1], [0], [0], [1], [0, 0, 1, 1], [], []>} : vector<8x8xf32>, vector<8x8xf32>, vector<8x8xf32> -> vector<8x8xf32>
    %c24 = arith.constant 24 : index
    %c0_31 = arith.constant 0 : index
    %76 = vector.load %arg6[%c24, %c0_31] : memref<32x32xf32, #tpu.memory_space<vmem>>, vector<8x32xf32>
    %cst_32 = arith.constant dense<0.000000e+00> : vector<8x32xf32>
    %77 = tpu.matmul %75, %76, %cst_32 {dimension_numbers = #tpu.dot_dimension_numbers<[1], [0], [0], [1], [0, 0, 1, 1], [], []>} : vector<8x8xf32>, vector<8x32xf32>, vector<8x32xf32> -> vector<8x32xf32>
    %78 = arith.addf %60, %77 : vector<8x32xf32>
    %c0_33 = arith.constant 0 : index
    %c0_34 = arith.constant 0 : index
    %c0_35 = arith.constant 0 : index
    %79 = vector.load %arg5[%c0_33, %c0_34, %c0_35] : memref<1x8x32xf32, #tpu.memory_space<vmem>>, vector<1x8x32xf32>
    %80 = vector.shape_cast %79 : vector<1x8x32xf32> to vector<8x32xf32>
    %81 = arith.addf %80, %78 : vector<8x32xf32>
    %c0_36 = arith.constant 0 : index
    %c0_37 = arith.constant 0 : index
    %82 = vector.load %arg7[%c0_36, %c0_37] : memref<1x32xf32, #tpu.memory_space<vmem>>, vector<1x32xf32>
    %83 = vector.broadcast %82 : vector<1x32xf32> to vector<8x32xf32>
    %84 = arith.addf %81, %83 : vector<8x32xf32>
    %cst_38 = arith.constant dense<0.000000e+00> : vector<8xf32>
    %85 = vector.multi_reduction <add>, %84, %cst_38 [1] : vector<8x32xf32> to vector<8xf32>
    %86 = vector.shape_cast %85 : vector<8xf32> to vector<8x1xf32>
    %cst_39 = arith.constant 3.200000e+01 : f32
    %87 = vector.broadcast %cst_39 : f32 to vector<8x1xf32>
    %88 = arith.divf %86, %87 : vector<8x1xf32>
    %89 = vector.broadcast %88 : vector<8x1xf32> to vector<8x32xf32>
    %90 = arith.subf %84, %89 : vector<8x32xf32>
    %91 = arith.mulf %90, %90 : vector<8x32xf32>
    %cst_40 = arith.constant dense<0.000000e+00> : vector<8xf32>
    %92 = vector.multi_reduction <add>, %91, %cst_40 [1] : vector<8x32xf32> to vector<8xf32>
    %93 = vector.shape_cast %92 : vector<8xf32> to vector<8x1xf32>
    %cst_41 = arith.constant 3.200000e+01 : f32
    %94 = vector.broadcast %cst_41 : f32 to vector<8x1xf32>
    %95 = arith.divf %93, %94 : vector<8x1xf32>
    %96 = vector.broadcast %88 : vector<8x1xf32> to vector<8x32xf32>
    %97 = arith.subf %84, %96 : vector<8x32xf32>
    %cst_42 = arith.constant 9.99999974E-6 : f32
    %98 = vector.broadcast %cst_42 : f32 to vector<8x1xf32>
    %99 = arith.addf %95, %98 : vector<8x1xf32>
    %100 = math.rsqrt %99 : vector<8x1xf32>
    %101 = vector.broadcast %100 : vector<8x1xf32> to vector<8x32xf32>
    %102 = arith.mulf %97, %101 : vector<8x32xf32>
    %c0_43 = arith.constant 0 : index
    %c0_44 = arith.constant 0 : index
    %103 = vector.load %arg8[%c0_43, %c0_44] : memref<1x32xf32, #tpu.memory_space<vmem>>, vector<1x32xf32>
    %104 = vector.broadcast %103 : vector<1x32xf32> to vector<8x32xf32>
    %105 = arith.mulf %102, %104 : vector<8x32xf32>
    %c0_45 = arith.constant 0 : index
    %c0_46 = arith.constant 0 : index
    %106 = vector.load %arg9[%c0_45, %c0_46] : memref<1x32xf32, #tpu.memory_space<vmem>>, vector<1x32xf32>
    %107 = vector.broadcast %106 : vector<1x32xf32> to vector<8x32xf32>
    %108 = arith.addf %105, %107 : vector<8x32xf32>
    %c0_47 = arith.constant 0 : index
    %c0_48 = arith.constant 0 : index
    %c0_49 = arith.constant 0 : index
    %109 = vector.load %arg10[%c0_47, %c0_48, %c0_49] : memref<1x8x32xf32, #tpu.memory_space<vmem>>, vector<1x8x32xf32>
    %110 = vector.shape_cast %109 : vector<1x8x32xf32> to vector<8x32xf32>
    %111 = vector.shape_cast %108 : vector<8x32xf32> to vector<1x8x32xf32>
    tpu.vector_store %arg10[%c0_47, %c0_48, %c0_49], %111 {strides = array<i32>} : memref<1x8x32xf32, #tpu.memory_space<vmem>>, vector<1x8x32xf32>,
    return
  }
  func.func @transform_0(%arg0: i32, %arg1: i32) -> (i32, i32, i32) {
    %c0_i32 = arith.constant 0 : i32
    %c0_i32_0 = arith.constant 0 : i32
    return %arg0, %arg1, %c0_i32 : i32, i32, i32
  }
  func.func @transform_1(%arg0: i32, %arg1: i32) -> (i32, i32, i32) {
    %c0_i32 = arith.constant 0 : i32
    %c0_i32_0 = arith.constant 0 : i32
    %c0_i32_1 = arith.constant 0 : i32
    return %arg0, %c0_i32, %c0_i32_0 : i32, i32, i32
  }
  func.func @transform_2(%arg0: i32, %arg1: i32) -> (i32, i32, i32) {
    %c0_i32 = arith.constant 0 : i32
    %c0_i32_0 = arith.constant 0 : i32
    %c0_i32_1 = arith.constant 0 : i32
    return %arg0, %c0_i32, %c0_i32_0 : i32, i32, i32
  }
  func.func @transform_3(%arg0: i32, %arg1: i32) -> (i32, i32, i32) {
    %c0_i32 = arith.constant 0 : i32
    %c0_i32_0 = arith.constant 0 : i32
    return %arg0, %arg1, %c0_i32 : i32, i32, i32
  }
  func.func @transform_4(%arg0: i32, %arg1: i32) -> (i32, i32) {
    %c0_i32 = arith.constant 0 : i32
    %c0_i32_0 = arith.constant 0 : i32
    %c0_i32_1 = arith.constant 0 : i32
    return %c0_i32, %c0_i32_0 : i32, i32
  }
  func.func @transform_5(%arg0: i32, %arg1: i32) -> (i32, i32) {
    %c0_i32 = arith.constant 0 : i32
    %c0_i32_0 = arith.constant 0 : i32
    %c0_i32_1 = arith.constant 0 : i32
    return %c0_i32, %c0_i32_0 : i32, i32
  }
  func.func @transform_6(%arg0: i32, %arg1: i32) -> (i32, i32) {
    %c0_i32 = arith.constant 0 : i32
    %c0_i32_0 = arith.constant 0 : i32
    %c0_i32_1 = arith.constant 0 : i32
    return %c0_i32, %c0_i32_0 : i32, i32
  }
  func.func @transform_7(%arg0: i32, %arg1: i32) -> (i32, i32) {
    %c0_i32 = arith.constant 0 : i32
    %c0_i32_0 = arith.constant 0 : i32
    %c0_i32_1 = arith.constant 0 : i32
    return %c0_i32, %c0_i32_0 : i32, i32
  }
  func.func @transform_8(%arg0: i32, %arg1: i32) -> (i32, i32, i32) {
    %c0_i32 = arith.constant 0 : i32
    %c0_i32_0 = arith.constant 0 : i32
    return %arg0, %arg1, %c0_i32 : i32, i32, i32
  }
}

module attributes {stable_mosaic.version = 11 : i64} {
  func.func @_ffn_kernel(%arg0: i32, %arg1: i32, %arg2: memref<16x32xf32, #tpu.memory_space<vmem>>, %arg3: memref<32x64xf32, #tpu.memory_space<vmem>>, %arg4: memref<1x64xf32, #tpu.memory_space<vmem>>, %arg5: memref<64x32xf32, #tpu.memory_space<vmem>>, %arg6: memref<1x32xf32, #tpu.memory_space<vmem>>, %arg7: memref<1x32xf32, #tpu.memory_space<vmem>>, %arg8: memref<1x32xf32, #tpu.memory_space<vmem>>, %arg9: memref<16x32xf32, #tpu.memory_space<vmem>>, %arg10: memref<16x32xf32, #tpu.memory_space<vmem>>) attributes {dimension_semantics = [#tpu.dimension_semantics<parallel>, #tpu.dimension_semantics<arbitrary>], iteration_bounds = array<i64: 1, 1>, scalar_prefetch = 0 : i64, scratch_operands = 1 : i64, tpu.core_type = #tpu.core_type<tc>, window_params = [{transform_indices = @transform_0, window_bounds = array<i64: 16, 32>}, {transform_indices = @transform_1, window_bounds = array<i64: 32, 64>}, {transform_indices = @transform_2, window_bounds = array<i64: 1, 64>}, {transform_indices = @transform_3, window_bounds = array<i64: 64, 32>}, {pipeline_mode = #tpu.pipeline_mode<synchronous>, transform_indices = @transform_4, window_bounds = array<i64: 1, 32>}, {pipeline_mode = #tpu.pipeline_mode<synchronous>, transform_indices = @transform_5, window_bounds = array<i64: 1, 32>}, {pipeline_mode = #tpu.pipeline_mode<synchronous>, transform_indices = @transform_6, window_bounds = array<i64: 1, 32>}, {transform_indices = @transform_7, window_bounds = array<i64: 16, 32>}]} {
    %c0_i32 = arith.constant 0 : i32
    %0 = arith.cmpi eq, %arg1, %c0_i32 : i32
    %1 = arith.extui %0 : i1 to i32
    %c0_i32_0 = arith.constant 0 : i32
    %2 = arith.cmpi ne, %1, %c0_i32_0 : i32
    scf.if %2 {
      %cst_16 = arith.constant 0.000000e+00 : f32
      %19 = vector.broadcast %cst_16 : f32 to vector<16x32xf32>
      %c0_17 = arith.constant 0 : index
      %c0_18 = arith.constant 0 : index
      %20 = vector.load %arg10[%c0_17, %c0_18] : memref<16x32xf32, #tpu.memory_space<vmem>>, vector<16x32xf32>
      tpu.vector_store %arg10[%c0_17, %c0_18], %19 {strides = array<i32>} : memref<16x32xf32, #tpu.memory_space<vmem>>, vector<16x32xf32>,
    } else {
    }
    %c0 = arith.constant 0 : index
    %c0_1 = arith.constant 0 : index
    %3 = vector.load %arg2[%c0, %c0_1] : memref<16x32xf32, #tpu.memory_space<vmem>>, vector<16x32xf32>
    %c0_2 = arith.constant 0 : index
    %c0_3 = arith.constant 0 : index
    %4 = vector.load %arg3[%c0_2, %c0_3] : memref<32x64xf32, #tpu.memory_space<vmem>>, vector<32x64xf32>
    %cst = arith.constant dense<0.000000e+00> : vector<16x64xf32>
    %5 = tpu.matmul %3, %4, %cst {dimension_numbers = #tpu.dot_dimension_numbers<[1], [0], [0], [1], [0, 0, 1, 1], [], []>} : vector<16x32xf32>, vector<32x64xf32>, vector<16x64xf32> -> vector<16x64xf32>
    %c0_4 = arith.constant 0 : index
    %c0_5 = arith.constant 0 : index
    %6 = vector.load %arg4[%c0_4, %c0_5] : memref<1x64xf32, #tpu.memory_space<vmem>>, vector<1x64xf32>
    %7 = vector.broadcast %6 : vector<1x64xf32> to vector<16x64xf32>
    %8 = arith.addf %5, %7 : vector<16x64xf32>
    %cst_6 = arith.constant 0.000000e+00 : f32
    %9 = vector.broadcast %cst_6 : f32 to vector<16x64xf32>
    %10 = arith.maximumf %8, %9 : vector<16x64xf32>
    %c0_7 = arith.constant 0 : index
    %c0_8 = arith.constant 0 : index
    %11 = vector.load %arg10[%c0_7, %c0_8] : memref<16x32xf32, #tpu.memory_space<vmem>>, vector<16x32xf32>
    %c0_9 = arith.constant 0 : index
    %c0_10 = arith.constant 0 : index
    %12 = vector.load %arg5[%c0_9, %c0_10] : memref<64x32xf32, #tpu.memory_space<vmem>>, vector<64x32xf32>
    %cst_11 = arith.constant dense<0.000000e+00> : vector<16x32xf32>
    %13 = tpu.matmul %10, %12, %cst_11 {dimension_numbers = #tpu.dot_dimension_numbers<[1], [0], [0], [1], [0, 0, 1, 1], [], []>} : vector<16x64xf32>, vector<64x32xf32>, vector<16x32xf32> -> vector<16x32xf32>
    %14 = arith.addf %11, %13 : vector<16x32xf32>
    %c0_12 = arith.constant 0 : index
    %c0_13 = arith.constant 0 : index
    %15 = vector.load %arg10[%c0_12, %c0_13] : memref<16x32xf32, #tpu.memory_space<vmem>>, vector<16x32xf32>
    tpu.vector_store %arg10[%c0_12, %c0_13], %14 {strides = array<i32>} : memref<16x32xf32, #tpu.memory_space<vmem>>, vector<16x32xf32>,
    %c0_i32_14 = arith.constant 0 : i32
    %16 = arith.cmpi eq, %arg1, %c0_i32_14 : i32
    %17 = arith.extui %16 : i1 to i32
    %c0_i32_15 = arith.constant 0 : i32
    %18 = arith.cmpi ne, %17, %c0_i32_15 : i32
    scf.if %18 {
      %c0_16 = arith.constant 0 : index
      %c0_17 = arith.constant 0 : index
      %19 = vector.load %arg10[%c0_16, %c0_17] : memref<16x32xf32, #tpu.memory_space<vmem>>, vector<16x32xf32>
      %20 = arith.addf %3, %19 : vector<16x32xf32>
      %c0_18 = arith.constant 0 : index
      %c0_19 = arith.constant 0 : index
      %21 = vector.load %arg6[%c0_18, %c0_19] : memref<1x32xf32, #tpu.memory_space<vmem>>, vector<1x32xf32>
      %22 = vector.broadcast %21 : vector<1x32xf32> to vector<16x32xf32>
      %23 = arith.addf %20, %22 : vector<16x32xf32>
      %cst_20 = arith.constant dense<0.000000e+00> : vector<16xf32>
      %24 = vector.multi_reduction <add>, %23, %cst_20 [1] : vector<16x32xf32> to vector<16xf32>
      %25 = vector.shape_cast %24 : vector<16xf32> to vector<16x1xf32>
      %cst_21 = arith.constant 3.200000e+01 : f32
      %26 = vector.broadcast %cst_21 : f32 to vector<16x1xf32>
      %27 = arith.divf %25, %26 : vector<16x1xf32>
      %28 = vector.broadcast %27 : vector<16x1xf32> to vector<16x32xf32>
      %29 = arith.subf %23, %28 : vector<16x32xf32>
      %30 = arith.mulf %29, %29 : vector<16x32xf32>
      %cst_22 = arith.constant dense<0.000000e+00> : vector<16xf32>
      %31 = vector.multi_reduction <add>, %30, %cst_22 [1] : vector<16x32xf32> to vector<16xf32>
      %32 = vector.shape_cast %31 : vector<16xf32> to vector<16x1xf32>
      %cst_23 = arith.constant 3.200000e+01 : f32
      %33 = vector.broadcast %cst_23 : f32 to vector<16x1xf32>
      %34 = arith.divf %32, %33 : vector<16x1xf32>
      %35 = vector.broadcast %27 : vector<16x1xf32> to vector<16x32xf32>
      %36 = arith.subf %23, %35 : vector<16x32xf32>
      %cst_24 = arith.constant 9.99999974E-6 : f32
      %37 = vector.broadcast %cst_24 : f32 to vector<16x1xf32>
      %38 = arith.addf %34, %37 : vector<16x1xf32>
      %39 = math.rsqrt %38 : vector<16x1xf32>
      %40 = vector.broadcast %39 : vector<16x1xf32> to vector<16x32xf32>
      %41 = arith.mulf %36, %40 : vector<16x32xf32>
      %c0_25 = arith.constant 0 : index
      %c0_26 = arith.constant 0 : index
      %42 = vector.load %arg7[%c0_25, %c0_26] : memref<1x32xf32, #tpu.memory_space<vmem>>, vector<1x32xf32>
      %43 = vector.broadcast %42 : vector<1x32xf32> to vector<16x32xf32>
      %44 = arith.mulf %41, %43 : vector<16x32xf32>
      %c0_27 = arith.constant 0 : index
      %c0_28 = arith.constant 0 : index
      %45 = vector.load %arg8[%c0_27, %c0_28] : memref<1x32xf32, #tpu.memory_space<vmem>>, vector<1x32xf32>
      %46 = vector.broadcast %45 : vector<1x32xf32> to vector<16x32xf32>
      %47 = arith.addf %44, %46 : vector<16x32xf32>
      %c0_29 = arith.constant 0 : index
      %c0_30 = arith.constant 0 : index
      %48 = vector.load %arg9[%c0_29, %c0_30] : memref<16x32xf32, #tpu.memory_space<vmem>>, vector<16x32xf32>
      tpu.vector_store %arg9[%c0_29, %c0_30], %47 {strides = array<i32>} : memref<16x32xf32, #tpu.memory_space<vmem>>, vector<16x32xf32>,
    } else {
    }
    return
  }
  func.func @transform_0(%arg0: i32, %arg1: i32) -> (i32, i32) {
    %c0_i32 = arith.constant 0 : i32
    %c0_i32_0 = arith.constant 0 : i32
    return %arg0, %c0_i32 : i32, i32
  }
  func.func @transform_1(%arg0: i32, %arg1: i32) -> (i32, i32) {
    %c0_i32 = arith.constant 0 : i32
    %c0_i32_0 = arith.constant 0 : i32
    return %c0_i32, %arg1 : i32, i32
  }
  func.func @transform_2(%arg0: i32, %arg1: i32) -> (i32, i32) {
    %c0_i32 = arith.constant 0 : i32
    %c0_i32_0 = arith.constant 0 : i32
    return %c0_i32, %arg1 : i32, i32
  }
  func.func @transform_3(%arg0: i32, %arg1: i32) -> (i32, i32) {
    %c0_i32 = arith.constant 0 : i32
    %c0_i32_0 = arith.constant 0 : i32
    return %arg1, %c0_i32 : i32, i32
  }
  func.func @transform_4(%arg0: i32, %arg1: i32) -> (i32, i32) {
    %c0_i32 = arith.constant 0 : i32
    %c0_i32_0 = arith.constant 0 : i32
    %c0_i32_1 = arith.constant 0 : i32
    return %c0_i32, %c0_i32_0 : i32, i32
  }
  func.func @transform_5(%arg0: i32, %arg1: i32) -> (i32, i32) {
    %c0_i32 = arith.constant 0 : i32
    %c0_i32_0 = arith.constant 0 : i32
    %c0_i32_1 = arith.constant 0 : i32
    return %c0_i32, %c0_i32_0 : i32, i32
  }
  func.func @transform_6(%arg0: i32, %arg1: i32) -> (i32, i32) {
    %c0_i32 = arith.constant 0 : i32
    %c0_i32_0 = arith.constant 0 : i32
    %c0_i32_1 = arith.constant 0 : i32
    return %c0_i32, %c0_i32_0 : i32, i32
  }
  func.func @transform_7(%arg0: i32, %arg1: i32) -> (i32, i32) {
    %c0_i32 = arith.constant 0 : i32
    %c0_i32_0 = arith.constant 0 : i32
    return %arg0, %c0_i32 : i32, i32
  }
}

</mosaic_0001>

<bundles_post_ra>
// kernel: pyraformer_layer.3
= control target key start
LH: loop header
LB: loop body
LE: loop exit
PB: predicated region body
PF: predicated region fallthrough
CT: control target
= control target key end

     0   :  { %vm42_vm0 = vcmask 261120   ;;  %s505_s1 = inlined_call_operand.vmem [shape: f32[32,32], index: 1, kind: input, shape index: {}]   ;;  %s506_s2 = inlined_call_operand.vmem [shape: f32[32,32], index: 2, kind: input, shape index: {}]   ;;  %s507_s0 = inlined_call_operand.vmem [shape: f32[16,32], index: 0, kind: input, shape index: {}]   ;;  %s508_s3 = inlined_call_operand.vmem [shape: f32[32,32], index: 3, kind: input, shape index: {}]   ;;  %s509_s4 = inlined_call_operand.vmem [shape: f32[1,32], index: 4, kind: input, shape index: {}]   ;;  %s510_s5 = inlined_call_operand.vmem [shape: f32[1,32], index: 5, kind: input, shape index: {}]   ;;  %s511_s7 = inlined_call_operand.vmem [shape: f32[16,32], index: 7, kind: output, shape index: {0}]   ;;  %s512_s6 = inlined_call_operand.vmem [shape: f32[1,32], index: 6, kind: input, shape index: {}]   ;;  %s513_s8 = inlined_call_operand.vmem [shape: f32[16,32], index: 8, kind: output, shape index: {1}]   ;;  %s514_s9 = inlined_call_operand.vmem [shape: f32[16,32], index: 9, kind: output, shape index: {2}]  }
   0x1   :  { %v34_v0 = vld [vmem:[%s505_s1 + $0x18] sm:$0xff]  ;;  %v33_v1 = vld [vmem:[%s505_s1 + $0x10] sm:$0xff]  ;;  %v29_v3 = vld [vmem:[%s507_s0] sm:$0xff] }
   0x2   :  { %341 = vmatprep.subr.mxu0 %v34_v0  ;;  %v129_v2 = vld [vmem:[%s506_s2 + $0x18] sm:$0xff]  ;;  %v32_v4 = vld [vmem:[%s505_s1 + $0x8] sm:$0xff]  ;;  %v128_v5 = vld [vmem:[%s506_s2 + $0x10] sm:$0xff]  ;;  %349 = vmatprep.mubr.msk.f32.mxu0 %vm42_vm0, %v29_v3 }
   0x3   :  { %342 = vmatpush3.msra.mxu0 %v34_v0  ;;  %352 = vmatprep.subr.mxu1 %v129_v2  ;;  %v31_v6 = vld [vmem:[%s505_s1] sm:$0xff]  ;;  %v127_v7 = vld [vmem:[%s506_s2 + $0x8] sm:$0xff]  ;;  %v217_v9 = vld [vmem:[%s508_s3 + $0x18] sm:$0xff] }
   0x4   :  { %343 = vmatprep.subr.mxu0 %v33_v1  ;;  %353 = vmatpush3.msra.mxu1 %v129_v2  ;;  %v30_v8 = vld [vmem:[%s507_s0 + $0x8] sm:$0xff]  ;;  %v126_v10 = vld [vmem:[%s506_s2] sm:$0xff]  ;;  %v216_v11 = vld [vmem:[%s508_s3 + $0x10] sm:$0xff] }
   0x5   :  { %344 = vmatpush3.msra.mxu0 %v33_v1  ;;  %354 = vmatprep.subr.mxu1 %v128_v5  ;;  %v215_v12 = vld [vmem:[%s508_s3 + $0x8] sm:$0xff]  ;;  %v214_v13 = vld [vmem:[%s508_s3] sm:$0xff] }
   0x6   :  { %345 = vmatprep.subr.mxu0 %v32_v4  ;;  %355 = vmatpush3.msra.mxu1 %v128_v5  ;;  %v314_v14 = vld [vmem:[%s509_s4] ss:$0 sm:$0xff] }
   0x7   :  { %346 = vmatpush3.msra.mxu0 %v32_v4  ;;  %356 = vmatprep.subr.mxu1 %v127_v7  ;;  %v317_v18 = vld [vmem:[%s510_s5] ss:$0 sm:$0xff] }
   0x8   :  { %347 = vmatprep.subr.mxu0 %v31_v6  ;;  %357 = vmatpush3.msra.mxu1 %v127_v7  ;;  %v320_v23 = vld [vmem:[%s512_s6] ss:$0 sm:$0xff] }
   0x9   :  { %348 = vmatpush3.msra.mxu0 %v31_v6  ;;  %358 = vmatprep.subr.mxu1 %v126_v10 }
   0xa   :  { %350 = vmatmul.mubr.msk.f32.vlgmr.msra.gmra.mxu0 %vm42_vm0, %v30_v8  ;;  %363 = vmatprep.subr.mxu0 %v217_v9 }
   0xb   :  { %364 = vmatpush3.msra.mxu0 %v217_v9  ;;  %359 = vmatpush3.msra.mxu1 %v126_v10 }
   0xc   :  { %365 = vmatprep.subr.mxu0 %v216_v11  ;;  %360 = vmatprep.mubr.msk.f32.mxu1 %vm42_vm0, %v29_v3 }
   0xd   :  { %366 = vmatpush3.msra.mxu0 %v216_v11  ;;  %361 = vmatmul.mubr.msk.f32.vlgmr.msra.gmra.mxu1 %vm42_vm0, %v30_v8 }
   0xe   :  { %367 = vmatprep.subr.mxu0 %v215_v12  ;;  %371 = vmatprep.mubr.msk.f32.mxu0 %vm42_vm0, %v29_v3 }
   0xf   :  { %368 = vmatpush3.msra.mxu0 %v215_v12 }
  0x10   :  { %369 = vmatprep.subr.mxu0 %v214_v13 }
  0x11   :  { %370 = vmatpush3.msra.mxu0 %v214_v13 }
  0x12   :  { %372 = vmatmul.mubr.msk.f32.vlgmr.msra.gmra.mxu0 %vm42_vm0, %v30_v8 }
  0xca   :  { %v351_v15 = vpop.f32.mrf.mxu0 }
  0xcb   :  { %v121_v16 = vadd.f32 %v351_v15, %v314_v14 }
  0xcc   :  { %v115_v17 = vpop.f32.mrf.mxu0 }
  0xcd   :  { %125 = vst.msk [vmem:[%s511_s7 + $0x8] sm:$0xff] %vm42_vm0, %v121_v16  ;;  %v116_v19 = vadd.f32 %v314_v14, %v115_v17  ;;  %v362_v20 = vpop.f32.mrf.mxu1 }
  0xce   :  { %v209_v21 = vadd.f32 %v362_v20, %v317_v18 }
  0xcf   :  { %124 = vst.msk [vmem:[%s511_s7] sm:$0xff] %vm42_vm0, %v116_v19  ;;  %v203_v22 = vpop.f32.mrf.mxu1 }
  0xd0   :  { %213 = vst.msk [vmem:[%s513_s8 + $0x8] sm:$0xff] %vm42_vm0, %v209_v21  ;;  %v204_v24 = vadd.f32 %v317_v18, %v203_v22 }
  0xd2   :  { %v373_v25 = vpop.f32.mrf.mxu0  ;;  %212 = vst.msk [vmem:[%s513_s8] sm:$0xff] %vm42_vm0, %v204_v24 }
  0xd3   :  { %v297_v26 = vadd.f32 %v373_v25, %v320_v23 }
  0xd4   :  { %v291_v27 = vpop.f32.mrf.mxu0 }
  0xd5   :  { %301 = vst.msk [vmem:[%s514_s9 + $0x8] sm:$0xff] %vm42_vm0, %v297_v26  ;;  %v292_v28 = vadd.f32 %v320_v23, %v291_v27 }
  0xd7   :  { %300 = vst.msk [vmem:[%s514_s9] sm:$0xff] %vm42_vm0, %v292_v28 }

// kernel: pyraformer_layer.5
= control target key start
LH: loop header
LB: loop body
LE: loop exit
PB: predicated region body
PF: predicated region fallthrough
CT: control target
= control target key end

     0   :  { %vm30_vm0 = vcmask 261120   ;;  %v352_v14 = vmov 0.0   ;;  %vm140_vm1 = vcmask 523264   ;;  %s465_s1 = inlined_call_operand.vmem [shape: f32[32,64], index: 1, kind: input, shape index: {}]   ;;  %s466_s0 = inlined_call_operand.vmem [shape: f32[16,32], index: 0, kind: input, shape index: {}]   ;;  %s467_s3 = inlined_call_operand.vmem [shape: f32[64,32], index: 3, kind: input, shape index: {}]   ;;  %s468_s2 = inlined_call_operand.vmem [shape: f32[1,64], index: 2, kind: input, shape index: {}]   ;;  %s469_s4 = inlined_call_operand.vmem [shape: f32[1,32], index: 4, kind: input, shape index: {}]   ;;  %s470_s5 = inlined_call_operand.vmem [shape: f32[1,32], index: 5, kind: input, shape index: {}]   ;;  %s471_s6 = inlined_call_operand.vmem [shape: f32[1,32], index: 6, kind: input, shape index: {}]   ;;  %s472_s7 = inlined_call_operand.vmem [shape: f32[16,32], index: 7, kind: output, shape index: {}]  }
   0x1   :  { %v38_v0 = vld [vmem:[%s465_s1 + $0x18] sm:$0xff]  ;;  %v37_v1 = vld [vmem:[%s465_s1 + $0x10] sm:$0xff]  ;;  %v33_v2 = vld [vmem:[%s466_s0] sm:$0xff]  ;;  %32 = vst.msk [vmem:[#allocation2 + $0x8] sm:$0xff] %vm30_vm0, %v352_v14 }
   0x2   :  { %317 = vmatprep.subr.mxu0 %v38_v0  ;;  %v36_v3 = vld [vmem:[%s465_s1 + $0x8] sm:$0xff]  ;;  %325 = vmatprep.mubr.msk.f32.mxu0 %vm30_vm0, %v33_v2  ;;  %v139_v4 = vld [vmem:[%s467_s3 + $0x38] sm:$0xff]  ;;  %v138_v5 = vld [vmem:[%s467_s3 + $0x30] sm:$0xff]  ;;  %31 = vst.msk [vmem:[#allocation2] sm:$0xff] %vm30_vm0, %v352_v14 }
   0x3   :  { %318 = vmatpush3.msra.mxu0 %v38_v0  ;;  %328 = vmatprep.subr.mxu1 %v139_v4  ;;  %v35_v6 = vld [vmem:[%s465_s1] sm:$0xff]  ;;  %v137_v7 = vld [vmem:[%s467_s3 + $0x28] sm:$0xff]  ;;  %v135_v10 = vld [vmem:[%s467_s3 + $0x18] sm:$0xff] }
   0x4   :  { %319 = vmatprep.subr.mxu0 %v37_v1  ;;  %329 = vmatpush3.msra.mxu1 %v139_v4  ;;  %v34_v8 = vld [vmem:[%s466_s0 + $0x8] sm:$0xff]  ;;  %v136_v9 = vld [vmem:[%s467_s3 + $0x20] sm:$0xff]  ;;  %v134_v11 = vld [vmem:[%s467_s3 + $0x10] sm:$0xff] }
   0x5   :  { %320 = vmatpush3.msra.mxu0 %v37_v1  ;;  %330 = vmatprep.subr.mxu1 %v138_v5  ;;  %v133_v12 = vld [vmem:[%s467_s3 + $0x8] sm:$0xff]  ;;  %v132_v13 = vld [vmem:[%s467_s3] sm:$0xff] }
   0x6   :  { %321 = vmatprep.subr.mxu0 %v36_v3  ;;  %331 = vmatpush3.msra.mxu1 %v138_v5  ;;  %v293_v15 = vld [vmem:[%s468_s2] ss:$0 sm:$0xff] }
   0x7   :  { %322 = vmatpush3.msra.mxu0 %v36_v3  ;;  %332 = vmatprep.subr.mxu1 %v137_v7  ;;  %v298_v32 = vld [vmem:[%s469_s4] ss:$0 sm:$0xff] }
   0x8   :  { %323 = vmatprep.subr.mxu0 %v35_v6  ;;  %333 = vmatpush3.msra.mxu1 %v137_v7  ;;  %v131_v22 = vld [vmem:[#allocation2 + $0x8] sm:$0xff]  ;;  %v299_v54 = vld [vmem:[%s470_s5] ss:$0 sm:$0xff] }
   0x9   :  { %324 = vmatpush3.msra.mxu0 %v35_v6  ;;  %334 = vmatprep.subr.mxu1 %v136_v9  ;;  %v130_v24 = vld [vmem:[#allocation2] sm:$0xff] }
   0xa   :  { %326 = vmatmul.mubr.msk.f32.vlgmr.msra.gmra.mxu0 %vm30_vm0, %v34_v8  ;;  %335 = vmatpush3.msra.mxu1 %v136_v9  ;;  %v300_v56 = vld [vmem:[%s471_s6] ss:$0 sm:$0xff] }
   0xb   :  { %336 = vmatprep.subr.mxu1 %v135_v10 }
   0xc   :  { %337 = vmatpush3.msra.mxu1 %v135_v10 }
   0xd   :  { %338 = vmatprep.subr.mxu1 %v134_v11 }
   0xe   :  { %339 = vmatpush3.msra.mxu1 %v134_v11 }
   0xf   :  { %340 = vmatprep.subr.mxu1 %v133_v12 }
  0x10   :  { %341 = vmatpush3.msra.mxu1 %v133_v12 }
  0x11   :  { %342 = vmatprep.subr.mxu1 %v132_v13 }
  0x12   :  { %343 = vmatpush3.msra.mxu1 %v132_v13 }
  0xca   :  { %v327_v16 = vpop.f32.mrf.mxu0 }
  0xcb   :  { %v125_v17 = vadd.f32 %v327_v16, %v293_v15 }
  0xcc   :  { %v119_v18 = vpop.f32.mrf.mxu0 }
  0xcd   :  { %v120_v19 = vadd.f32 %v293_v15, %v119_v18  ;;  %v129_v21 = vmax.f32 %v125_v17, 0.0 }
  0xcf   :  { %v128_v20 = vmax.f32 %v120_v19, 0.0 }
  0xd1   :  { %344 = vmatprep.mubr.msk.f32.mxu1 %vm140_vm1, %v128_v20 }
  0xd2   :  { %345 = vmatmul.mubr.msk.f32.vlgmr.msra.gmra.mxu1 %vm140_vm1, %v129_v21 }
 0x192   :  { %v346_v23 = vpop.f32.mrf.mxu1 }
 0x193   :  { %v223_v25 = vadd.f32 %v346_v23, %v131_v22 }
 0x194   :  { %v213_v26 = vpop.f32.mrf.mxu1 }
 0x195   :  { %225 = vst.msk [vmem:[#allocation2 + $0x8] sm:$0xff] %vm30_vm0, %v223_v25  ;;  %v222_v27 = vadd.f32 %v213_v26, %v130_v24 }
 0x197   :  { %224 = vst.msk [vmem:[#allocation2] sm:$0xff] %vm30_vm0, %v222_v27 }
 0x19c   :  { %v230_v28 = vld [vmem:[#allocation2 + $0x8] sm:$0xff] }
 0x19d   :  { %v232_v31 = vadd.f32 %v230_v28, %v34_v8 }
 0x19e   :  { %v229_v29 = vld [vmem:[#allocation2] sm:$0xff] }
 0x19f   :  { %v231_v30 = vadd.f32 %v229_v29, %v33_v2  ;;  %v241_v35 = vadd.f32 %v298_v32, %v232_v31 }
 0x1a1   :  { %v240_v33 = vadd.f32 %v298_v32, %v231_v30  ;;  %v245_v36 = vsel %vm30_vm0, %v241_v35, 0.0 }
 0x1a3   :  { %v242_v34 = vsel %vm30_vm0, %v240_v33, 0.0 }
 0x1a4   :  { %243 = vadd.xlane.f32.xlu0 %v242_v34 }
 0x1a8   :  { %246 = vadd.xlane.f32.xlu0 %v245_v36 }
 0x22d   :  { %v244_v37 = vpop.xlane.xlu0 %243 }
 0x22e   :  { %v249_v38 = vmul.f32 0.03125, %v244_v37 }
 0x230   :  { %v251_v39 = vsub.f32 %v240_v33, %v249_v38 }
 0x231   :  { %v247_v40 = vpop.xlane.xlu0 %246 }
 0x232   :  { %v250_v41 = vmul.f32 0.03125, %v247_v40  ;;  %v253_v42 = vmul.f32 %v251_v39, %v251_v39 }
 0x234   :  { %v252_v43 = vsub.f32 %v241_v35, %v250_v41  ;;  %v255_v44 = vsel %vm30_vm0, %v253_v42, 0.0 }
 0x235   :  { %256 = vadd.xlane.f32.xlu1 %v255_v44 }
 0x236   :  { %v254_v45 = vmul.f32 %v252_v43, %v252_v43 }
 0x238   :  { %v258_v46 = vsel %vm30_vm0, %v254_v45, 0.0 }
 0x239   :  { %259 = vadd.xlane.f32.xlu1 %v258_v46 }
 0x2be   :  { %v257_v47 = vpop.xlane.xlu1 %256 }
 0x2bf   :  { %v261_v48 = vmul.f32 0.03125, %v257_v47 }
 0x2c1   :  { %v263_v49 = vadd.f32 1e-05, %v261_v48 }
 0x2c2   :  { %v260_v50 = vpop.xlane.xlu1 %259 }
 0x2c3   :  { %348 = vrsqrt.f32 %v263_v49  ;;  %v262_v51 = vmul.f32 0.03125, %v260_v50 }
 0x2c5   :  { %v264_v52 = vadd.f32 1e-05, %v262_v51 }
 0x2c7   :  { %350 = vrsqrt.f32 %v264_v52 }
 0x2d0   :  { %v349_v53 = vpop.eup %348 }
 0x2d1   :  { %v267_v55 = vmul.f32 %v349_v53, %v251_v39 }
 0x2d3   :  { %v276_v57 = vmul.f32 %v299_v54, %v267_v55 }
 0x2d4   :  { %v351_v58 = vpop.eup %350 }
 0x2d5   :  { %v285_v59 = vadd.f32 %v300_v56, %v276_v57  ;;  %v268_v60 = vmul.f32 %v351_v58, %v252_v43 }
 0x2d7   :  { %287 = vst.msk [vmem:[%s472_s7] sm:$0xff] %vm30_vm0, %v285_v59  ;;  %v277_v61 = vmul.f32 %v299_v54, %v268_v60 }
 0x2d9   :  { %v286_v62 = vadd.f32 %v300_v56, %v277_v61 }
 0x2db   :  { %288 = vst.msk [vmem:[%s472_s7 + $0x8] sm:$0xff] %vm30_vm0, %v286_v62 }

// kernel: pyraformer_layer.4
= control target key start
LH: loop header
LB: loop body
LE: loop exit
PB: predicated region body
PF: predicated region fallthrough
CT: control target
= control target key end

     0   :  { %s1743_s27 = smov 0   ;;  %s1745_s28 = smov 0   ;;  %s1900_s0 = inlined_call_operand.vmem [shape: f32[2,8,32], index: 0, kind: input, shape index: {}]   ;;  %s1901_s1 = inlined_call_operand.vmem [shape: f32[2,8,32], index: 1, kind: input, shape index: {}]   ;;  %s1902_s2 = inlined_call_operand.vmem [shape: f32[2,8,32], index: 2, kind: input, shape index: {}]   ;;  %s1903_s3 = inlined_call_operand.vmem [shape: f32[2,8,32], index: 3, kind: input, shape index: {}]   ;;  %s1904_s4 = inlined_call_operand.vmem [shape: f32[32,32], index: 4, kind: input, shape index: {}]   ;;  %s1905_s5 = inlined_call_operand.vmem [shape: f32[1,32], index: 5, kind: input, shape index: {}]   ;;  %s1906_s6 = inlined_call_operand.vmem [shape: f32[1,32], index: 6, kind: input, shape index: {}]   ;;  %s1907_s7 = inlined_call_operand.vmem [shape: f32[1,32], index: 7, kind: input, shape index: {}]   ;;  %s1908_s8 = inlined_call_operand.vmem [shape: f32[2,8,32], index: 8, kind: output, shape index: {}]  }
   0x1   :  { %s1747_s29 = smov 0  }
   0x2 LB: > { %s30_s30 = sadd.s32 1, %s1687_s28  ;;  %p1511_p0 = scmp.ge.s32.totalorder %s1691_s29, 1  ;;  %s1691_s29 = sphi %s1747_s29, %s18_s29   ;;  %s1687_s28 = sphi %s1745_s28, %s1910_s28   ;;  %s1683_s27 = sphi %s1743_s27, %s1909_s27  }
   0x3   : > { %p32_p1 = scmp.ge.s32.totalorder %s30_s30, 2  ;;  %p312_p2 = scmp.lt.s32.totalorder %s1691_s29, 3 }
   0x5   : > { %s1912_s30 = smov (%p32_p1, %s30_s30), 0  ;;  %p313_p3 = pnand %p1511_p0, %p312_p2 }
   0x6   : > { %p365_p4 = scmp.lt.s32.totalorder (!%p313_p3), %s1683_s27, 1  ;;  %s1695_s16 = smov (!%p313_p3), 120  }
   0x7   : > { %316 = sbr.rel (%p313_p3) target bundleno = 2945 (0xb81), region = 52  ;;  %s1696_s22 = smov (!%p313_p3), 112  }
   0x8   : > { %s1697_s25 = smov (!%p313_p3), 104  }
   0xc   : > { %v1693_v0 = vmov 0.0   ;;  %vm1694_vm0 = vmmov 0   ;;  %s1914_s27 = smov (!%p365_p4, %s1683_s27), 1  ;;  %vm397_vm1 = vcmask 64512   ;;  %v725_v28 = vld [vmem:[%s1904_s4 + $0x8] sm:$0xff]  ;;  %v558_v32 = vld [vmem:[%s1904_s4] sm:$0xff] }
   0xd   : > { %1562 = vmatprep.subr.mxu0 %v1693_v0  ;;  %1564 = vmatprep.mubr.msk.f32.mxu0 %vm1694_vm0, %v1693_v0  ;;  %s1767_s9 = sshll.u32 %s1914_s27, 3  ;;  %v1037_v55 = vld [vmem:[%s1904_s4 + $0x10] sm:$0xff]  ;;  %vm1362_vm2 = vcmask 261120  }
   0xe   : > { %1567 = vmatprep.subr.mxu1 %v1693_v0  ;;  %1569 = vmatprep.mubr.msk.f32.mxu1 %vm1694_vm0, %v1693_v0  ;;  %s375_s12 = scalar_lea.vmem %s1901_s1, %s1767_s9  ;;  %s371_s15 = scalar_lea.vmem %s1900_s0, %s1767_s9 }
   0xf   : > { %v1773_v1 = vld [vmem:[%s375_s12] sm:$0xff]  ;;  %s379_s19 = scalar_lea.vmem %s1902_s2, %s1767_s9  ;;  %s386_s14 = scalar_lea.vmem %s1903_s3, %s1767_s9 }
  0x10   : > { %1563 = vmatpush3.xpose.msk.msra.mxu0 %vm397_vm1, %v1773_v1  ;;  %v1781_v2 = vld [vmem:[%s371_s15] sm:$0xff]  ;;  %561 = vrot.lane.b32.xlu1 %v1773_v1, %s1695_s16  ;;  %s393_s23 = scalar_lea.vmem %s1908_s8, %s1767_s9 }
  0x11   : > { %1577 = vmatprep.subr.mxu0 %v1693_v0  ;;  %v1798_v11 = vld [vmem:[%s379_s19] sm:$0xff] }
  0x12   : > { %1568 = vmatpush3.msra.mxu1 %v1798_v11 }
  0x13   : > { %1565 = vmatmul.mubr.msk.f32.vlgmr.msra.gmra.mxu0 %vm397_vm1, %v1781_v2  ;;  %1572 = vmatprep.subr.mxu1 %v1693_v0 }
  0x14   : > { %1579 = vmatprep.mubr.msk.f32.mxu0 %vm1694_vm0, %v1693_v0  ;;  %559 = vrot.lane.b32.xlu1 %v1781_v2, %s1695_s16 }
  0x82   : > { %v562_v13 = vpop.permute.xlu1 %561 }
  0x86   : > { %v560_v16 = vpop.permute.xlu1 %559 }
  0xd3   : > { %v470_v3 = vpop.f32.mrf.mxu0 }
  0xd4   : > { %v474_v4 = vsel %vm397_vm1, %v470_v3, -inf }
  0xd5   : > { %475 = vmax.xlane.f32.xlu0 %v474_v4  ;;  %v1566_v5 = vpop.f32.mrf.mxu0 }
 0x15e   : > { %v476_v6 = vpop.xlane.xlu0 %475 }
 0x15f   : > { %v477_v7 = vsub.f32 %v470_v3, %v476_v6 }
 0x161   : > { %v478_v8 = vmul.f32 1.442695, %v477_v7 }
 0x163   : > { %1651 = vpow2.f32 %v478_v8 }
 0x170   : > { %v1652_v9 = vpop.eup %1651 }
 0x171   : > { %v480_v10 = vsel %vm397_vm1, %v1652_v9, 0.0 }
 0x172   : > { %481 = vadd.xlane.f32.xlu0 %v480_v10 }
 0x1fb   : > { %v482_v12 = vpop.xlane.xlu0 %481 }
 0x1fc   : > { %1653 = vrcp.f32 %v482_v12 }
 0x209   : > { %v1654_v14 = vpop.eup %1653 }
 0x20a   : > { %v484_v15 = vmul.f32 %v1654_v14, %v1652_v9  ;;  %v1352_v14 = vld [vmem:[%s386_s14] sm:$0xff] }
 0x20c   : > { %1570 = vmatmul.mubr.msk.f32.vlgmr.msra.gmra.mxu1 %vm397_vm1, %v484_v15 }
 0x20d   : > { %1573 = vmatpush3.xpose.msk.msra.mxu1 %vm397_vm1, %v562_v13  ;;  %1574 = vmatprep.mubr.msk.f32.mxu1 %vm1694_vm0, %v1693_v0 }
 0x20e   : > { %1582 = vmatprep.subr.mxu1 %v1693_v0 }
 0x210   : > { %1575 = vmatmul.mubr.msk.f32.vlgmr.msra.gmra.mxu1 %vm397_vm1, %v560_v16 }
 0x211   : > { %1584 = vmatprep.mubr.msk.f32.mxu1 %vm1694_vm0, %v1693_v0  ;;  %1583 = vmatpush3.msra.mxu1 %v725_v28 }
 0x212   : > { %1592 = vmatprep.subr.mxu1 %v1693_v0 }
 0x2cc   : > { %v554_v17 = vpop.f32.mrf.mxu1 }
 0x2ce   : > { %v1571_v18 = vpop.f32.mrf.mxu1 }
 0x2d0   : > { %v633_v19 = vpop.f32.mrf.mxu1 }
 0x2d1   : > { %v637_v20 = vsel %vm397_vm1, %v633_v19, -inf }
 0x2d2   : > { %638 = vmax.xlane.f32.xlu0 %v637_v20  ;;  %v1576_v21 = vpop.f32.mrf.mxu1 }
 0x2e8   : > { %649 = vrot.lane.b32.xlu0 %v1798_v11, %s1695_s16 }
 0x2ec   : > { %874 = vrot.lane.b32.xlu0 %v1773_v1, %s1696_s22 }
 0x2f0   : > { %872 = vrot.lane.b32.xlu0 %v1781_v2, %s1696_s22 }
 0x35b   : > { %v639_v22 = vpop.xlane.xlu0 %638 }
 0x35c   : > { %v640_v23 = vsub.f32 %v633_v19, %v639_v22 }
 0x35e   : > { %v641_v24 = vmul.f32 1.442695, %v640_v23 }
 0x35f   : > { %v650_v27 = vpop.permute.xlu0 %649 }
 0x360   : > { %1655 = vpow2.f32 %v641_v24  ;;  %1578 = vmatpush3.msra.mxu0 %v650_v27 }
 0x361   : > { %1587 = vmatprep.subr.mxu0 %v1693_v0 }
 0x363   : > { %v875_v33 = vpop.permute.xlu0 %874 }
 0x367   : > { %v873_v36 = vpop.permute.xlu0 %872 }
 0x36d   : > { %v1656_v25 = vpop.eup %1655 }
 0x36e   : > { %v643_v26 = vsel %vm397_vm1, %v1656_v25, 0.0 }
 0x36f   : > { %644 = vadd.xlane.f32.xlu1 %v643_v26 }
 0x380   : > { %961 = vrot.lane.b32.xlu1 %v1798_v11, %s1696_s22 }
 0x384   : > { %1114 = vrot.lane.b32.xlu1 %v1773_v1, %s1697_s25 }
 0x3f8   : > { %v645_v29 = vpop.xlane.xlu1 %644 }
 0x3f9   : > { %1657 = vrcp.f32 %v645_v29 }
 0x3fc   : > { %v962_v44 = vpop.permute.xlu1 %961 }
 0x400   : > { %v1115_v50 = vpop.permute.xlu1 %1114 }
 0x406   : > { %v1658_v30 = vpop.eup %1657 }
 0x407   : > { %v647_v31 = vmul.f32 %v1658_v30, %v1656_v25  ;;  %v1534_v30 = vld [vmem:[%s1906_s6] ss:$0 sm:$0xff] }
 0x409   : > { %1580 = vmatmul.mubr.msk.f32.vlgmr.msra.gmra.mxu0 %vm397_vm1, %v647_v31 }
 0x40a   : > { %1588 = vmatpush3.msra.mxu0 %v558_v32  ;;  %1589 = vmatprep.mubr.msk.f32.mxu0 %vm1694_vm0, %v1693_v0  ;;  %v1535_v32 = vld [vmem:[%s1907_s7] ss:$0 sm:$0xff] }
 0x40b   : > { %1597 = vmatprep.subr.mxu0 %v1693_v0 }
 0x40d   : > { %1590 = vmatmul.mubr.msk.f32.vlgmr.msra.gmra.mxu0 %vm397_vm1, %v554_v17  ;;  %v1533_v17 = vld [vmem:[%s1905_s5] ss:$0 sm:$0xff] }
 0x40e   : > { %1599 = vmatprep.mubr.msk.f32.mxu0 %vm1694_vm0, %v1693_v0  ;;  %1598 = vmatpush3.msra.mxu0 %v962_v44 }
 0x40f   : > { %1607 = vmatprep.subr.mxu0 %v1693_v0 }
 0x4c9   : > { %v721_v34 = vpop.f32.mrf.mxu0 }
 0x4ca   : > { %1585 = vmatmul.mubr.msk.f32.vlgmr.msra.gmra.mxu1 %vm397_vm1, %v721_v34 }
 0x4cb   : > { %1593 = vmatpush3.xpose.msk.msra.mxu1 %vm397_vm1, %v875_v33  ;;  %v1581_v35 = vpop.f32.mrf.mxu0  ;;  %1594 = vmatprep.mubr.msk.f32.mxu1 %vm1694_vm0, %v1693_v0 }
 0x4cc   : > { %1602 = vmatprep.subr.mxu1 %v1693_v0 }
 0x4cd   : > { %v868_v37 = vpop.f32.mrf.mxu0 }
 0x4ce   : > { %1595 = vmatmul.mubr.msk.f32.vlgmr.msra.gmra.mxu1 %vm397_vm1, %v873_v36 }
 0x4cf   : > { %v1591_v38 = vpop.f32.mrf.mxu0  ;;  %1604 = vmatprep.mubr.msk.f32.mxu1 %vm1694_vm0, %v1693_v0  ;;  %1603 = vmatpush3.msra.mxu1 %v1037_v55 }
 0x4d0   : > { %1612 = vmatprep.subr.mxu1 %v1693_v0 }
 0x58a   : > { %v795_v39 = vpop.f32.mrf.mxu1 }
 0x58b   : > { %v869_v4 = vadd.f32 %v868_v37, %v795_v39 }
 0x58c   : > { %v1586_v40 = vpop.f32.mrf.mxu1 }
 0x58e   : > { %v946_v41 = vpop.f32.mrf.mxu1 }
 0x58f   : > { %v950_v42 = vsel %vm397_vm1, %v946_v41, -inf }
 0x590   : > { %951 = vmax.xlane.f32.xlu0 %v950_v42  ;;  %v1596_v43 = vpop.f32.mrf.mxu1 }
 0x619   : > { %v952_v45 = vpop.xlane.xlu0 %951 }
 0x61a   : > { %v953_v46 = vsub.f32 %v946_v41, %v952_v45 }
 0x61c   : > { %v954_v47 = vmul.f32 1.442695, %v953_v46 }
 0x61e   : > { %1659 = vpow2.f32 %v954_v47 }
 0x62b   : > { %v1660_v48 = vpop.eup %1659 }
 0x62c   : > { %v956_v49 = vsel %vm397_vm1, %v1660_v48, 0.0 }
 0x62d   : > { %957 = vadd.xlane.f32.xlu1 %v956_v49 }
 0x63e   : > { %1112 = vrot.lane.b32.xlu1 %v1781_v2, %s1697_s25 }
 0x6b6   : > { %v958_v51 = vpop.xlane.xlu1 %957 }
 0x6b7   : > { %1661 = vrcp.f32 %v958_v51 }
 0x6ba   : > { %v1113_v54 = vpop.permute.xlu1 %1112 }
 0x6c4   : > { %v1662_v52 = vpop.eup %1661 }
 0x6c5   : > { %v960_v53 = vmul.f32 %v1662_v52, %v1660_v48 }
 0x6c7   : > { %1600 = vmatmul.mubr.msk.f32.vlgmr.msra.gmra.mxu0 %vm397_vm1, %v960_v53 }
 0x6c8   : > { %1608 = vmatpush3.xpose.msk.msra.mxu0 %vm397_vm1, %v1115_v50  ;;  %1609 = vmatprep.mubr.msk.f32.mxu0 %vm1694_vm0, %v1693_v0 }
 0x6c9   : > { %1617 = vmatprep.subr.mxu0 %v1693_v0 }
 0x6cb   : > { %1610 = vmatmul.mubr.msk.f32.vlgmr.msra.gmra.mxu0 %vm397_vm1, %v1113_v54 }
 0x6cc   : > { %1619 = vmatprep.mubr.msk.f32.mxu0 %vm1694_vm0, %v1693_v0 }
 0x787   : > { %v1033_v56 = vpop.f32.mrf.mxu0 }
 0x788   : > { %1605 = vmatmul.mubr.msk.f32.vlgmr.msra.gmra.mxu1 %vm397_vm1, %v1033_v56 }
 0x789   : > { %v1601_v57 = vpop.f32.mrf.mxu0  ;;  %1614 = vmatprep.mubr.msk.f32.mxu1 %vm1694_vm0, %v1693_v0  ;;  %v1277_v0 = vld [vmem:[%s1904_s4 + $0x18] sm:$0xff] }
 0x78a   : > { %1618 = vmatpush3.msra.mxu0 %v1277_v0 }
 0x78b   : > { %v1186_v58 = vpop.f32.mrf.mxu0 }
 0x78c   : > { %v1190_v59 = vsel %vm397_vm1, %v1186_v58, -inf }
 0x78d   : > { %1191 = vmax.xlane.f32.xlu0 %v1190_v59  ;;  %v1611_v60 = vpop.f32.mrf.mxu0 }
 0x7a3   : > { %1201 = vrot.lane.b32.xlu0 %v1798_v11, %s1697_s25 }
 0x816   : > { %v1192_v61 = vpop.xlane.xlu0 %1191 }
 0x817   : > { %v1193_v62 = vsub.f32 %v1186_v58, %v1192_v61 }
 0x819   : > { %v1194_v63 = vmul.f32 1.442695, %v1193_v62 }
 0x81a   : > { %v1202_v3 = vpop.permute.xlu0 %1201 }
 0x81b   : > { %1663 = vpow2.f32 %v1194_v63  ;;  %1613 = vmatpush3.msra.mxu1 %v1202_v3 }
 0x828   : > { %v1664_v1 = vpop.eup %1663 }
 0x829   : > { %v1196_v2 = vsel %vm397_vm1, %v1664_v1, 0.0 }
 0x82a   : > { %1197 = vadd.xlane.f32.xlu1 %v1196_v2 }
 0x848   : > { %v1107_v5 = vpop.f32.mrf.mxu1 }
 0x849   : > { %v1111_v6 = vadd.f32 %v1107_v5, %v869_v4 }
 0x84a   : > { %v1606_v7 = vpop.f32.mrf.mxu1 }
 0x8b3   : > { %v1198_v8 = vpop.xlane.xlu1 %1197 }
 0x8b4   : > { %1665 = vrcp.f32 %v1198_v8 }
 0x8c1   : > { %v1666_v9 = vpop.eup %1665 }
 0x8c2   : > { %v1200_v10 = vmul.f32 %v1666_v9, %v1664_v1 }
 0x8c4   : > { %1615 = vmatmul.mubr.msk.f32.vlgmr.msra.gmra.mxu1 %vm397_vm1, %v1200_v10 }
 0x984   : > { %v1273_v11 = vpop.f32.mrf.mxu1 }
 0x985   : > { %1620 = vmatmul.mubr.msk.f32.vlgmr.msra.gmra.mxu0 %vm397_vm1, %v1273_v11 }
 0x986   : > { %v1616_v12 = vpop.f32.mrf.mxu1 }
 0xa45   : > { %v1347_v13 = vpop.f32.mrf.mxu0 }
 0xa46   : > { %v1351_v15 = vadd.f32 %v1347_v13, %v1111_v6 }
 0xa47   : > { %v1621_v16 = vpop.f32.mrf.mxu0 }
 0xa48   : > { %v1353_v18 = vadd.f32 %v1352_v14, %v1351_v15 }
 0xa4a   : > { %v1361_v19 = vadd.f32 %v1533_v17, %v1353_v18 }
 0xa4c   : > { %v1363_v20 = vsel %vm1362_vm2, %v1361_v19, 0.0 }
 0xa4d   : > { %1364 = vadd.xlane.f32.xlu0 %v1363_v20 }
 0xad6   : > { %v1365_v21 = vpop.xlane.xlu0 %1364 }
 0xad7   : > { %v1367_v22 = vmul.f32 0.03125, %v1365_v21 }
 0xad9   : > { %v1368_v23 = vsub.f32 %v1361_v19, %v1367_v22 }
 0xadb   : > { %v1369_v24 = vmul.f32 %v1368_v23, %v1368_v23 }
 0xadd   : > { %v1370_v25 = vsel %vm1362_vm2, %v1369_v24, 0.0 }
 0xade   : > { %1371 = vadd.xlane.f32.xlu1 %v1370_v25 }
 0xb67   : > { %v1372_v26 = vpop.xlane.xlu1 %1371 }
 0xb68   : > { %v1373_v27 = vmul.f32 0.03125, %v1372_v26 }
 0xb6a   : > { %v1374_v28 = vadd.f32 1e-05, %v1373_v27 }
 0xb6c   : > { %1667 = vrsqrt.f32 %v1374_v28 }
 0xb79   : > { %v1668_v29 = vpop.eup %1667 }
 0xb7a   : > { %v1376_v31 = vmul.f32 %v1668_v29, %v1368_v23 }
 0xb7c   : > { %v1384_v33 = vmul.f32 %v1534_v30, %v1376_v31 }
 0xb7e   : > { %v1392_v34 = vadd.f32 %v1535_v32, %v1384_v33 }
 0xb80   : > { %1393 = vst.msk [vmem:[%s393_s23] sm:$0xff] %vm1362_vm2, %v1392_v34 }
 0xb81 PF: > { %s18_s29 = sadd.s32 1, %s1691_s29   ;;  %s1909_s27 = smov %s1687_s28 }
 0xb82   : > { %p15_p5 = scmp.ge.s32.totalorder %s18_s29, 4   ;;  %s1910_s28 = smov %s1912_s30 }
 0xb84   :  { %17 = sbr.rel (!%p15_p5) target bundleno = 2 (0x2), region = 91 }

</bundles_post_ra>
